<compile_context>
chip_gen: v5e
topology: v5e:2x2
jax: 0.10.0
libtpu: 0.0.40
codegen_flags: <defaults>
</compile_context>

<pallas_src>
import math
import functools

import jax
import jax.numpy as jnp
from jax.experimental import pallas as pl
from jax.experimental.pallas import tpu as pltpu


def lm_head_kernel(x_ref, wd_ref, bd_ref, g_ref, be_ref, wdec_ref, bdec_ref,
                   o_ref, t_ref, *, eps):
    j = pl.program_id(1)

    # --- BertPredictionHeadTransform: dense -> erf-GELU -> LayerNorm ---
    # Independent of the vocab tile: compute once per row tile, cache in VMEM scratch.
    @pl.when(j == 0)
    def _():
        x = x_ref[...]                                                   # (TM, H)
        h = jnp.dot(x.astype(jnp.bfloat16),
                    wd_ref[...].astype(jnp.bfloat16),
                    preferred_element_type=jnp.float32)
        h = h + bd_ref[...].astype(jnp.float32)
        # erf-form GELU (matches the PyTorch reference exactly).
        h = h * 0.5 * (1.0 + jax.lax.erf(h * (1.0 / math.sqrt(2.0))))
        mu = jnp.mean(h, axis=-1, keepdims=True)
        var = jnp.mean(jnp.square(h - mu), axis=-1, keepdims=True)
        h = (h - mu) * jax.lax.rsqrt(var + eps)
        h = h * g_ref[...].astype(jnp.float32) + be_ref[...].astype(jnp.float32)
        t_ref[...] = h.astype(t_ref.dtype)                               # bf16 cache

    # --- Decoder tile: (TM, H) @ (H, TV) + bias tile -> logits tile ---
    logits = jnp.dot(t_ref[...],
                     wdec_ref[...].astype(jnp.bfloat16),
                     preferred_element_type=jnp.float32)
    o_ref[...] = (logits + bdec_ref[...].astype(jnp.float32)).astype(o_ref.dtype)


def _pick_tile(n, target, align):
    """Largest divisor of n that is <= target and a multiple of `align` (else n)."""
    if n <= target:
        return n
    for t in range(min(target, n), 0, -1):
        if n % t == 0 and t % align == 0:
            return t
    return n


def bert_lm_prediction_head(hidden_states, params, *, eps=1e-12, tm=256, tv=512):
    B, S, H = hidden_states.shape
    V = params['wdec'].shape[1]
    rows = B * S
    x = hidden_states.reshape(rows, H)

    tm = _pick_tile(rows, tm, 8)
    tv = _pick_tile(V, tv, 128)
    assert rows % tm == 0 and V % tv == 0, "tile sizes must divide the problem"

    const = lambda ndims: (lambda i, j: (0,) * ndims)

    in_specs = [
        pl.BlockSpec((tm, H), lambda i, j: (i, 0)),       # hidden_states row tile
        pl.BlockSpec((H, H), const(2)),                   # transform dense W (resident)
        pl.BlockSpec((1, H), const(2)),                   # transform dense b
        pl.BlockSpec((1, H), const(2)),                   # LayerNorm gamma
        pl.BlockSpec((1, H), const(2)),                   # LayerNorm beta
        pl.BlockSpec((H, tv), lambda i, j: (0, j)),       # decoder W, streamed over V
        pl.BlockSpec((1, tv), lambda i, j: (0, j)),       # decoder bias tile
    ]

    kernel = functools.partial(lm_head_kernel, eps=eps)
    out = pl.pallas_call(
        kernel,
        out_shape=jax.ShapeDtypeStruct((rows, V), jnp.float32),
        grid_spec=pltpu.PrefetchScalarGridSpec(
            num_scalar_prefetch=0,
            grid=(rows // tm, V // tv),
            in_specs=in_specs,
            out_specs=pl.BlockSpec((tm, tv), lambda i, j: (i, j)),
            scratch_shapes=[pltpu.VMEM((tm, H), jnp.bfloat16)],  # cached transform
        ),
        compiler_params=pltpu.CompilerParams(
            dimension_semantics=("parallel", "arbitrary"),
            vmem_limit_bytes=48 * 1024 * 1024,
        ),
    )(x, params['wd'], params['bd'], params['g'], params['be'],
      params['wdec'], params['bdec'])
    return out.reshape(B, S, V)


def reference_lm_head(hidden_states, p, *, eps=1e-12):
    """Pure-JAX reference mirroring the PyTorch BertLMPredictionHead forward."""
    h = hidden_states @ p['wd'] + p['bd']
    h = h * 0.5 * (1.0 + jax.lax.erf(h / math.sqrt(2.0)))
    mu = h.mean(-1, keepdims=True)
    var = ((h - mu) ** 2).mean(-1, keepdims=True)
    h = (h - mu) / jnp.sqrt(var + eps) * p['g'] + p['be']
    return h @ p['wdec'] + p['bdec']


if __name__ == "__main__":
    B, S, H, V = 2, 8, 32, 128
    EPS = 1e-12
    key = jax.random.PRNGKey(0)
    keys = jax.random.split(key, 8)

    def init(k, shape, scale=0.05):
        return (scale * jax.random.normal(k, shape)).astype(jnp.float32)

    emb = init(keys[0], (V, H))                   # bert_model_embedding_weights (V, H)
    params = {
        'wd': init(keys[1], (H, H)),              # transform dense, (in, out)
        'bd': init(keys[2], (1, H)),
        'g': jnp.ones((1, H), jnp.float32),       # LayerNorm gamma
        'be': jnp.zeros((1, H), jnp.float32),     # LayerNorm beta
        'wdec': emb.T,                            # (H, V): decoder(x) = x @ emb.T
        'bdec': init(keys[3], (1, V)),            # decoder bias
    }
    hidden_states = jax.random.normal(keys[4], (B, S, H), jnp.float32)

    out = bert_lm_prediction_head(hidden_states, params, eps=EPS)
    out = jax.block_until_ready(out)

    ref = reference_lm_head(hidden_states, params, eps=EPS)
    # bf16 MXU operands (f32 accumulation) -> tolerance looser than pure-f32.
    assert out.shape == (B, S, V)
    assert jnp.allclose(out, ref, atol=3e-2, rtol=3e-2), "Pallas output mismatch vs reference"

    print("KERNEL_OK")
</pallas_src>

<mosaic_0001>
module attributes {stable_mosaic.version = 11 : i64} {
  func.func @lm_head_kernel(%arg0: i32, %arg1: i32, %arg2: memref<16x32xf32, #tpu.memory_space<vmem>>, %arg3: memref<32x32xf32, #tpu.memory_space<vmem>>, %arg4: memref<1x32xf32, #tpu.memory_space<vmem>>, %arg5: memref<1x32xf32, #tpu.memory_space<vmem>>, %arg6: memref<1x32xf32, #tpu.memory_space<vmem>>, %arg7: memref<32x128xf32, #tpu.memory_space<vmem>>, %arg8: memref<1x128xf32, #tpu.memory_space<vmem>>, %arg9: memref<16x128xf32, #tpu.memory_space<vmem>>, %arg10: memref<16x32xbf16, #tpu.memory_space<vmem>>) attributes {dimension_semantics = [#tpu.dimension_semantics<parallel>, #tpu.dimension_semantics<arbitrary>], iteration_bounds = array<i64: 1, 1>, scalar_prefetch = 0 : i64, scratch_operands = 1 : i64, tpu.core_type = #tpu.core_type<tc>, window_params = [{transform_indices = @transform_0, window_bounds = array<i64: 16, 32>}, {pipeline_mode = #tpu.pipeline_mode<synchronous>, transform_indices = @transform_1, window_bounds = array<i64: 32, 32>}, {pipeline_mode = #tpu.pipeline_mode<synchronous>, transform_indices = @transform_2, window_bounds = array<i64: 1, 32>}, {pipeline_mode = #tpu.pipeline_mode<synchronous>, transform_indices = @transform_3, window_bounds = array<i64: 1, 32>}, {pipeline_mode = #tpu.pipeline_mode<synchronous>, transform_indices = @transform_4, window_bounds = array<i64: 1, 32>}, {transform_indices = @transform_5, window_bounds = array<i64: 32, 128>}, {transform_indices = @transform_6, window_bounds = array<i64: 1, 128>}, {transform_indices = @transform_7, window_bounds = array<i64: 16, 128>}]} {
    %c0_i32 = arith.constant 0 : i32
    %0 = arith.cmpi eq, %arg1, %c0_i32 : i32
    %1 = arith.extui %0 : i1 to i32
    %c0_i32_0 = arith.constant 0 : i32
    %2 = arith.cmpi ne, %1, %c0_i32_0 : i32
    scf.if %2 {
      %c0_8 = arith.constant 0 : index
      %c0_9 = arith.constant 0 : index
      %11 = vector.load %arg2[%c0_8, %c0_9] : memref<16x32xf32, #tpu.memory_space<vmem>>, vector<16x32xf32>
      %12 = arith.truncf %11 : vector<16x32xf32> to vector<16x32xbf16>
      %c0_10 = arith.constant 0 : index
      %c0_11 = arith.constant 0 : index
      %13 = vector.load %arg3[%c0_10, %c0_11] : memref<32x32xf32, #tpu.memory_space<vmem>>, vector<32x32xf32>
      %14 = arith.truncf %13 : vector<32x32xf32> to vector<32x32xbf16>
      %cst_12 = arith.constant dense<0.000000e+00> : vector<16x32xf32>
      %15 = tpu.matmul %12, %14, %cst_12 {dimension_numbers = #tpu.dot_dimension_numbers<[1], [0], [0], [1], [0, 0, 1, 1], [], []>} : vector<16x32xbf16>, vector<32x32xbf16>, vector<16x32xf32> -> vector<16x32xf32>
      %c0_13 = arith.constant 0 : index
      %c0_14 = arith.constant 0 : index
      %16 = vector.load %arg4[%c0_13, %c0_14] : memref<1x32xf32, #tpu.memory_space<vmem>>, vector<1x32xf32>
      %17 = vector.broadcast %16 : vector<1x32xf32> to vector<16x32xf32>
      %18 = arith.addf %15, %17 : vector<16x32xf32>
      %cst_15 = arith.constant 5.000000e-01 : f32
      %19 = vector.broadcast %cst_15 : f32 to vector<16x32xf32>
      %20 = arith.mulf %18, %19 : vector<16x32xf32>
      %cst_16 = arith.constant 0.707106769 : f32
      %21 = vector.broadcast %cst_16 : f32 to vector<16x32xf32>
      %22 = arith.mulf %18, %21 : vector<16x32xf32>
      %23 = math.erf %22 : vector<16x32xf32>
      %cst_17 = arith.constant 1.000000e+00 : f32
      %24 = vector.broadcast %cst_17 : f32 to vector<16x32xf32>
      %25 = arith.addf %24, %23 : vector<16x32xf32>
      %26 = arith.mulf %20, %25 : vector<16x32xf32>
      %cst_18 = arith.constant dense<0.000000e+00> : vector<16xf32>
      %27 = vector.multi_reduction <add>, %26, %cst_18 [1] : vector<16x32xf32> to vector<16xf32>
      %28 = vector.shape_cast %27 : vector<16xf32> to vector<16x1xf32>
      %cst_19 = arith.constant 3.200000e+01 : f32
      %29 = vector.broadcast %cst_19 : f32 to vector<16x1xf32>
      %30 = arith.divf %28, %29 : vector<16x1xf32>
      %31 = vector.broadcast %30 : vector<16x1xf32> to vector<16x32xf32>
      %32 = arith.subf %26, %31 : vector<16x32xf32>
      %33 = arith.mulf %32, %32 : vector<16x32xf32>
      %cst_20 = arith.constant dense<0.000000e+00> : vector<16xf32>
      %34 = vector.multi_reduction <add>, %33, %cst_20 [1] : vector<16x32xf32> to vector<16xf32>
      %35 = vector.shape_cast %34 : vector<16xf32> to vector<16x1xf32>
      %cst_21 = arith.constant 3.200000e+01 : f32
      %36 = vector.broadcast %cst_21 : f32 to vector<16x1xf32>
      %37 = arith.divf %35, %36 : vector<16x1xf32>
      %38 = vector.broadcast %30 : vector<16x1xf32> to vector<16x32xf32>
      %39 = arith.subf %26, %38 : vector<16x32xf32>
      %cst_22 = arith.constant 9.99999996E-13 : f32
      %40 = vector.broadcast %cst_22 : f32 to vector<16x1xf32>
      %41 = arith.addf %37, %40 : vector<16x1xf32>
      %42 = math.rsqrt %41 : vector<16x1xf32>
      %43 = vector.broadcast %42 : vector<16x1xf32> to vector<16x32xf32>
      %44 = arith.mulf %39, %43 : vector<16x32xf32>
      %c0_23 = arith.constant 0 : index
      %c0_24 = arith.constant 0 : index
      %45 = vector.load %arg5[%c0_23, %c0_24] : memref<1x32xf32, #tpu.memory_space<vmem>>, vector<1x32xf32>
      %46 = vector.broadcast %45 : vector<1x32xf32> to vector<16x32xf32>
      %47 = arith.mulf %44, %46 : vector<16x32xf32>
      %c0_25 = arith.constant 0 : index
      %c0_26 = arith.constant 0 : index
      %48 = vector.load %arg6[%c0_25, %c0_26] : memref<1x32xf32, #tpu.memory_space<vmem>>, vector<1x32xf32>
      %49 = vector.broadcast %48 : vector<1x32xf32> to vector<16x32xf32>
      %50 = arith.addf %47, %49 : vector<16x32xf32>
      %51 = arith.truncf %50 : vector<16x32xf32> to vector<16x32xbf16>
      %c0_27 = arith.constant 0 : index
      %c0_28 = arith.constant 0 : index
      %52 = vector.load %arg10[%c0_27, %c0_28] : memref<16x32xbf16, #tpu.memory_space<vmem>>, vector<16x32xbf16>
      tpu.vector_store %arg10[%c0_27, %c0_28], %51 {strides = array<i32>} : memref<16x32xbf16, #tpu.memory_space<vmem>>, vector<16x32xbf16>,
    } else {
    }
    %c0 = arith.constant 0 : index
    %c0_1 = arith.constant 0 : index
    %3 = vector.load %arg10[%c0, %c0_1] : memref<16x32xbf16, #tpu.memory_space<vmem>>, vector<16x32xbf16>
    %c0_2 = arith.constant 0 : index
    %c0_3 = arith.constant 0 : index
    %4 = vector.load %arg7[%c0_2, %c0_3] : memref<32x128xf32, #tpu.memory_space<vmem>>, vector<32x128xf32>
    %5 = arith.truncf %4 : vector<32x128xf32> to vector<32x128xbf16>
    %cst = arith.constant dense<0.000000e+00> : vector<16x128xf32>
    %6 = tpu.matmul %3, %5, %cst {dimension_numbers = #tpu.dot_dimension_numbers<[1], [0], [0], [1], [0, 0, 1, 1], [], []>} : vector<16x32xbf16>, vector<32x128xbf16>, vector<16x128xf32> -> vector<16x128xf32>
    %c0_4 = arith.constant 0 : index
    %c0_5 = arith.constant 0 : index
    %7 = vector.load %arg8[%c0_4, %c0_5] : memref<1x128xf32, #tpu.memory_space<vmem>>, vector<1x128xf32>
    %8 = vector.broadcast %7 : vector<1x128xf32> to vector<16x128xf32>
    %9 = arith.addf %6, %8 : vector<16x128xf32>
    %c0_6 = arith.constant 0 : index
    %c0_7 = arith.constant 0 : index
    %10 = vector.load %arg9[%c0_6, %c0_7] : memref<16x128xf32, #tpu.memory_space<vmem>>, vector<16x128xf32>
    tpu.vector_store %arg9[%c0_6, %c0_7], %9 {strides = array<i32>} : memref<16x128xf32, #tpu.memory_space<vmem>>, vector<16x128xf32>,
    return
  }
  func.func @transform_0(%arg0: i32, %arg1: i32) -> (i32, i32) {
    %c0_i32 = arith.constant 0 : i32
    %c0_i32_0 = arith.constant 0 : i32
    return %arg0, %c0_i32 : i32, i32
  }
  func.func @transform_1(%arg0: i32, %arg1: i32) -> (i32, i32) {
    %c0_i32 = arith.constant 0 : i32
    %c0_i32_0 = arith.constant 0 : i32
    %c0_i32_1 = arith.constant 0 : i32
    return %c0_i32, %c0_i32_0 : i32, i32
  }
  func.func @transform_2(%arg0: i32, %arg1: i32) -> (i32, i32) {
    %c0_i32 = arith.constant 0 : i32
    %c0_i32_0 = arith.constant 0 : i32
    %c0_i32_1 = arith.constant 0 : i32
    return %c0_i32, %c0_i32_0 : i32, i32
  }
  func.func @transform_3(%arg0: i32, %arg1: i32) -> (i32, i32) {
    %c0_i32 = arith.constant 0 : i32
    %c0_i32_0 = arith.constant 0 : i32
    %c0_i32_1 = arith.constant 0 : i32
    return %c0_i32, %c0_i32_0 : i32, i32
  }
  func.func @transform_4(%arg0: i32, %arg1: i32) -> (i32, i32) {
    %c0_i32 = arith.constant 0 : i32
    %c0_i32_0 = arith.constant 0 : i32
    %c0_i32_1 = arith.constant 0 : i32
    return %c0_i32, %c0_i32_0 : i32, i32
  }
  func.func @transform_5(%arg0: i32, %arg1: i32) -> (i32, i32) {
    %c0_i32 = arith.constant 0 : i32
    %c0_i32_0 = arith.constant 0 : i32
    return %c0_i32, %arg1 : i32, i32
  }
  func.func @transform_6(%arg0: i32, %arg1: i32) -> (i32, i32) {
    %c0_i32 = arith.constant 0 : i32
    %c0_i32_0 = arith.constant 0 : i32
    return %c0_i32, %arg1 : i32, i32
  }
  func.func @transform_7(%arg0: i32, %arg1: i32) -> (i32, i32) {
    %c0_i32 = arith.constant 0 : i32
    return %arg0, %arg1 : i32, i32
  }
}

</mosaic_0001>

<bundles_post_ra>
// kernel: tpu_custom_call.1
= control target key start
LH: loop header
LB: loop body
LE: loop exit
PB: predicated region body
PF: predicated region fallthrough
CT: control target
= control target key end

     0   :  { %12 = vsyncpa [#allocation4], 0  ;;  %s557_s0 = inlined_call_operand.hbm [shape: f32[16,32], index: 0, kind: input, shape index: {}]   ;;  %s558_s1 = inlined_call_operand.hbm [shape: f32[32,32], index: 1, kind: input, shape index: {}]   ;;  %s559_s2 = inlined_call_operand.vmem [shape: f32[1,32], index: 2, kind: input, shape index: {}]   ;;  %s560_s3 = inlined_call_operand.vmem [shape: f32[1,32], index: 3, kind: input, shape index: {}]   ;;  %s561_s4 = inlined_call_operand.vmem [shape: f32[1,32], index: 4, kind: input, shape index: {}]   ;;  %s562_s5 = inlined_call_operand.hbm [shape: f32[32,128], index: 5, kind: input, shape index: {}]   ;;  %s563_s6 = inlined_call_operand.vmem [shape: f32[1,128], index: 6, kind: input, shape index: {}]   ;;  %s564_s7 = inlined_call_operand.hbm [shape: f32[16,128], index: 7, kind: output, shape index: {}]  }
   0x1   :  { %13 = vsyncpa [#allocation7], 0 }
   0x2   :  { %14 = vsyncpa [#allocation5], 0  ;;  %s32_s26 = sshll.u32 %s558_s1, 4  ;;  %s455_s27 = smov [#allocation6]   ;;  %s33_s26 = int_to_ptr.hbm [resolvable:$true] %s32_s26 }
   0x3   :  { %s34_s28 = sshll.u32 %s455_s27, 4  ;;  %s19_s8 = sshll.u32 %s557_s0, 4  ;;  %s35_s28 = int_to_ptr.vmem [resolvable:$true] %s34_s28  ;;  %s20_s8 = int_to_ptr.hbm [resolvable:$true] %s19_s8 }
   0x4   :  { %s456_s9 = smov 128   ;;  %s457_s10 = smov 8  }
   0x5   :  { %40 = dma.hbm_to_vmem [thread:$0]  %s33_s26, 512, %s35_s28, [#allocation7], %s456_s9, %s456_s9, %s457_s10  }
   0x6   :  { %s458_s11 = smov [#allocation3]   ;;  %s51_s1 = sshll.u32 %s562_s5, 4  ;;  %s52_s1 = int_to_ptr.hbm [resolvable:$true] %s51_s1 }
   0x7   :  { %s21_s12 = sshll.u32 %s458_s11, 4  ;;  %s459_s0 = smov [#allocation8]   ;;  %s22_s12 = int_to_ptr.vmem [resolvable:$true] %s21_s12 }
   0x8   :  { %27 = dma.hbm_to_vmem [thread:$0]  %s20_s8, 256, %s22_s12, [#allocation4], %s456_s9, %s456_s9, %s457_s10  }
   0x9   :  { %s53_s15 = sshll.u32 %s459_s0, 4  ;;  %s54_s15 = int_to_ptr.vmem [resolvable:$true] %s53_s15 }
   0xa   :  { %59 = dma.hbm_to_vmem [thread:$0]  %s52_s1, 512, %s54_s15, [#allocation7], %s456_s9, %s456_s9, %s457_s10  }
   0xb   :  { %449 = dma.done.wait [#allocation4], 256  }
   0xc   :  { %450 = vsyncadd [#allocation4], 4294967040 }
   0xd   :  { %451 = dma.done.wait [#allocation7], 1024  }
   0xe   :  { %452 = vsyncadd [#allocation7], 4294966272  ;;  %v84_v0 = vld [vmem:[#allocation6 + $0x10] sm:$0xff]  ;;  %v85_v1 = vld [vmem:[#allocation6 + $0x18] sm:$0xff]  ;;  %vm92_vm0 = vcmask 261120   ;;  %vm263_vm14 = vcmask 257024  }
   0xf   :  { %v82_v2 = vld [vmem:[#allocation6] sm:$0xff]  ;;  %v87_v3 = vpack.c.bf16 %v85_v1, %v84_v0  ;;  %v83_v4 = vld [vmem:[#allocation6 + $0x8] sm:$0xff]  ;;  %v79_v5 = vld [vmem:[#allocation3] sm:$0xff]  ;;  %s461_s20 = smov [#allocation9]   ;;  %s309_s24 = sshll.u32 %s564_s7, 4  ;;  %s310_s24 = int_to_ptr.hbm [resolvable:$true] %s309_s24 }
  0x10   :  { %v86_v6 = vpack.c.bf16 %v83_v4, %v82_v2  ;;  %v80_v7 = vld [vmem:[#allocation3 + $0x8] sm:$0xff]  ;;  %v339_v9 = vld [vmem:[%s559_s2] ss:$0 sm:$0xff]  ;;  %s307_s21 = sshll.u32 %s461_s20, 4  ;;  %s308_s21 = int_to_ptr.vmem [resolvable:$true] %s307_s21 }
  0x11   :  { %102 = vmatpush.bf16.msra.mxu0 %v87_v3  ;;  %v81_v8 = vpack.c.bf16 %v80_v7, %v79_v5 }
  0x15   :  { %103 = vmatpush.bf16.msra.mxu0 %v86_v6 }
  0x18   :  { %323 = vmatmul.msk.bf16.vlgmr.msra.gmra.mxu0 %vm92_vm0, %v81_v8 }
  0x95   :  { %v105_v10 = vpop.f32.mrf.mxu0 }
  0x96   :  { %v524_v11 = vadd.f32 %v339_v9, %v105_v10 }
  0x98   :  { %v112_v12 = vmul.f32 0.70710677, %v524_v11 }
  0x9a   :  { %v114_v13 = vmul.f32 %v112_v12, %v112_v12 }
  0x9c   :  { %v115_v14 = vmin.f32 %v114_v13, 16.0 }
  0x9d   :  { %v107_v15 = vpop.f32.mrf.mxu0 }
  0x9e   :  { %v116_v16 = vmul.f32 2.1237322e-06, %v115_v14  ;;  %v527_v17 = vadd.f32 %v339_v9, %v107_v15  ;;  %v127_v18 = vmul.f32 3.8918573e-05, %v115_v14 }
  0xa0   :  { %v117_v19 = vadd.f32 0.00028619796, %v116_v16  ;;  %v530_v20 = vmul.f32 0.70710677, %v527_v17  ;;  %v128_v21 = vadd.f32 0.001143296, %v127_v18 }
  0xa2   :  { %v118_v22 = vmul.f32 %v117_v19, %v115_v14  ;;  %v154_v23 = vmul.f32 %v530_v20, %v530_v20  ;;  %v129_v24 = vmul.f32 %v128_v21, %v115_v14  ;;  %v110_v19 = vmul.f32 0.5, %v524_v11 }
  0xa4   :  { %v155_v25 = vmin.f32 %v154_v23, 16.0  ;;  %v130_v26 = vadd.f32 0.014752088, %v129_v24  ;;  %v119_v27 = vadd.f32 0.0036580483, %v118_v22 }
  0xa6   :  { %v156_v28 = vmul.f32 2.1237322e-06, %v155_v25  ;;  %v167_v29 = vmul.f32 3.8918573e-05, %v155_v25  ;;  %v131_v30 = vmul.f32 %v130_v26, %v115_v14  ;;  %v120_v34 = vmul.f32 %v119_v27, %v115_v14 }
  0xa8   :  { %v157_v31 = vadd.f32 0.00028619796, %v156_v28  ;;  %v168_v32 = vadd.f32 0.001143296, %v167_v29  ;;  %v132_v33 = vadd.f32 0.112945676, %v131_v30 }
  0xa9   :  { %v121_v41 = vadd.f32 0.05243302, %v120_v34  ;;  %v111_v29 = vmul.f32 0.5, %v527_v17 }
  0xaa   :  { %v158_v35 = vmul.f32 %v157_v31, %v155_v25  ;;  %v169_v36 = vmul.f32 %v168_v32, %v155_v25  ;;  %v133_v37 = vmul.f32 %v132_v33, %v115_v14  ;;  %v460_v32 = vmov 32.0  }
  0xab   :  { %v122_v47 = vmul.f32 %v121_v41, %v115_v14 }
  0xac   :  { %v170_v38 = vadd.f32 0.014752088, %v169_v36  ;;  %v159_v39 = vadd.f32 0.0036580483, %v158_v35  ;;  %v134_v40 = vadd.f32 0.4994258, %v133_v37 }
  0xad   :  { %v123_v51 = vadd.f32 0.18741608, %v122_v47 }
  0xae   :  { %v171_v42 = vmul.f32 %v170_v38, %v155_v25  ;;  %v135_v43 = vmul.f32 %v134_v40, %v115_v14  ;;  %v160_v45 = vmul.f32 %v159_v39, %v155_v25 }
  0xaf   :  { %v124_v56 = vmul.f32 %v123_v51, %v115_v14  ;;  %v271_v51 = vld [vmem:[#allocation8 + $0x18] sm:$0xff] }
  0xb0   :  { %v172_v44 = vadd.f32 0.112945676, %v171_v42  ;;  %v136_v46 = vadd.f32 1.0, %v135_v43  ;;  %v161_v50 = vadd.f32 0.05243302, %v160_v45 }
  0xb1   :  { %v125_v61 = vadd.f32 1.1283791, %v124_v56 }
  0xb2   :  { %v173_v48 = vmul.f32 %v172_v44, %v155_v25  ;;  %343 = vrcp.f32 %v136_v46  ;;  %v162_v55 = vmul.f32 %v161_v50, %v155_v25  ;;  %v148_v60 = vand.u32 2147483648, %v136_v46  ;;  %v270_v50 = vld [vmem:[#allocation8 + $0x10] sm:$0xff] }
  0xb3   :  { %v146_v63 = vand.u32 2147483647, %v136_v46  ;;  %vm142_vm2 = vweird.f32 %v136_v46  ;;  %v126_v5 = vmul.f32 %v125_v61, %v112_v12 }
  0xb4   :  { %v174_v49 = vadd.f32 0.4994258, %v173_v48  ;;  %v163_v59 = vadd.f32 0.18741608, %v162_v55  ;;  %v149_v3 = vor.u32 1.1754944e-38, %v148_v60 }
  0xb5   :  { %vm147_vm4 = vcmp.eq.f32.partialorder %v146_v63, 8.507059e+37 }
  0xb6   :  { %v175_v52 = vmul.f32 %v174_v49, %v155_v25  ;;  %v164_v2 = vmul.f32 %v163_v59, %v155_v25 }
  0xb8   :  { %v176_v53 = vadd.f32 1.0, %v175_v52  ;;  %v344_v54 = vpop.eup %343  ;;  %v165_v13 = vadd.f32 1.1283791, %v164_v2  ;;  %v273_v52 = vpack.c.bf16 %v271_v51, %v270_v50 }
  0xb9   :  { %v138_v57 = vmul.f32 %v344_v54, %v136_v46  ;;  %vm143_vm1 = vweird.f32 %v344_v54 }
  0xba   :  { %345 = vrcp.f32 %v176_v53  ;;  %vm144_vm3 = vmor %vm142_vm2, %vm143_vm1  ;;  %v188_v10 = vand.u32 2147483648, %v176_v53  ;;  %v186_v15 = vand.u32 2147483647, %v176_v53  ;;  %vm182_vm6 = vweird.f32 %v176_v53  ;;  %293 = vmatpush.bf16.msra.mxu1 %v273_v52 }
  0xbb   :  { %v139_v58 = vsub.f32 1.0, %v138_v57  ;;  %v166_v12 = vmul.f32 %v165_v13, %v530_v20  ;;  %347 = vrcp.f32 %v460_v32 }
  0xbc   :  { %v189_v22 = vor.u32 1.1754944e-38, %v188_v10  ;;  %vm187_vm8 = vcmp.eq.f32.partialorder %v186_v15, 8.507059e+37 }
  0xbd   :  { %v140_v62 = vmul.f32 %v344_v54, %v139_v58 }
  0xbf   :  { %v141_v1 = vadd.f32 %v344_v54, %v140_v62 }
  0xc0   :  { %v346_v0 = vpop.eup %345 }
  0xc1   :  { %v178_v4 = vmul.f32 %v346_v0, %v176_v53  ;;  %v145_v6 = vsel %vm144_vm3, %v344_v54, %v141_v1  ;;  %vm183_vm5 = vweird.f32 %v346_v0  ;;  %v348_v33 = vpop.eup %347  ;;  %v268_v53 = vld [vmem:[#allocation8] sm:$0xff]  ;;  %v269_v54 = vld [vmem:[#allocation8 + $0x8] sm:$0xff] }
  0xc2   :  { %v150_v7 = vsel %vm147_vm4, %v149_v3, %v145_v6  ;;  %vm184_vm7 = vmor %vm182_vm6, %vm183_vm5  ;;  %v205_v20 = vmul.f32 32.0, %v348_v33  ;;  %vm209_vm9 = vweird.f32 %v348_v33  ;;  %v272_v57 = vpack.c.bf16 %v269_v54, %v268_v53  ;;  %v340_v3 = vld [vmem:[%s560_s3] ss:$0 sm:$0xff] }
  0xc3   :  { %v179_v8 = vsub.f32 1.0, %v178_v4  ;;  %v151_v9 = vmul.f32 %v150_v7, %v126_v5  ;;  %v341_v6 = vld [vmem:[%s561_s4] ss:$0 sm:$0xff] }
  0xc4   :  { %v206_v34 = vsub.f32 1.0, %v205_v20  ;;  %294 = vmatpush.bf16.msra.mxu1 %v272_v57 }
  0xc5   :  { %v180_v14 = vmul.f32 %v346_v0, %v179_v8  ;;  %v324_v16 = vclamps-f32 %v151_v9, 1.0 }
  0xc6   :  { %v207_v35 = vmul.f32 %v348_v33, %v206_v34 }
  0xc7   :  { %v181_v18 = vadd.f32 %v346_v0, %v180_v14  ;;  %v194_v21 = vadd.f32 1.0, %v324_v16 }
  0xc8   :  { %v208_v36 = vadd.f32 %v348_v33, %v207_v35 }
  0xc9   :  { %v185_v23 = vsel %vm184_vm7, %v346_v0, %v181_v18  ;;  %v196_v24 = vmul.f32 %v194_v21, %v110_v19 }
  0xca   :  { %v190_v25 = vsel %vm187_vm8, %v189_v22, %v185_v23  ;;  %v210_v37 = vsel %vm209_vm9, %v348_v33, %v208_v36  ;;  %v342_v23 = vld [vmem:[%s563_s6] ss:$0 sm:$0xff] }
  0xcb   :  { %v191_v26 = vmul.f32 %v190_v25, %v166_v12  ;;  %v198_v27 = vsel %vm92_vm0, %v196_v24, 0.0 }
  0xcc   :  { %199 = vadd.xlane.f32.xlu0 %v198_v27 }
  0xcd   :  { %v325_v28 = vclamps-f32 %v191_v26, 1.0 }
  0xcf   :  { %v195_v30 = vadd.f32 1.0, %v325_v28 }
  0xd1   :  { %v197_v31 = vmul.f32 %v195_v30, %v111_v29 }
  0xd3   :  { %v201_v11 = vsel %vm92_vm0, %v197_v31, 0.0 }
  0xd4   :  { %202 = vadd.xlane.f32.xlu0 %v201_v11 }
 0x13f   :  { %v200_v38 = vpop.xlane.xlu0 %199 }
 0x140   :  { %v211_v39 = vmul.f32 %v210_v37, %v200_v38 }
 0x142   :  { %v213_v40 = vsub.f32 %v196_v24, %v211_v39 }
 0x144   :  { %v215_v41 = vmul.f32 %v213_v40, %v213_v40 }
 0x146   :  { %v217_v17 = vsel %vm92_vm0, %v215_v41, 0.0 }
 0x147   :  { %218 = vadd.xlane.f32.xlu1 %v217_v17  ;;  %v203_v42 = vpop.xlane.xlu0 %202 }
 0x148   :  { %v212_v43 = vmul.f32 %v210_v37, %v203_v42 }
 0x14a   :  { %v214_v44 = vsub.f32 %v197_v31, %v212_v43 }
 0x14c   :  { %v216_v45 = vmul.f32 %v214_v44, %v214_v44 }
 0x14e   :  { %v220_v46 = vsel %vm92_vm0, %v216_v45, 0.0 }
 0x14f   :  { %221 = vadd.xlane.f32.xlu1 %v220_v46 }
 0x1ba   :  { %v219_v47 = vpop.xlane.xlu1 %218 }
 0x1bb   :  { %v223_v48 = vmul.f32 %v219_v47, %v210_v37 }
 0x1bd   :  { %v225_v49 = vadd.f32 1e-12, %v223_v48 }
 0x1bf   :  { %349 = vrsqrt.f32 %v225_v49  ;;  %vm233_vm11 = vweird.f32 %v225_v49 }
 0x1c2   :  { %v222_v55 = vpop.xlane.xlu1 %221 }
 0x1c3   :  { %v224_v56 = vmul.f32 %v222_v55, %v210_v37 }
 0x1c5   :  { %v350_v58 = vpop.eup %349  ;;  %v226_v59 = vadd.f32 1e-12, %v224_v56 }
 0x1c6   :  { %v228_v60 = vmul.f32 %v350_v58, %v225_v49  ;;  %vm234_vm10 = vweird.f32 %v350_v58 }
 0x1c7   :  { %351 = vrsqrt.f32 %v226_v59  ;;  %vm235_vm12 = vmor %vm233_vm11, %vm234_vm10  ;;  %vm243_vm15 = vweird.f32 %v226_v59 }
 0x1c8   :  { %v229_v61 = vmul.f32 %v350_v58, %v228_v60 }
 0x1ca   :  { %v230_v62 = vmul.f32 0.5, %v229_v61 }
 0x1cc   :  { %v231_v63 = vsub.f32 1.5, %v230_v62 }
 0x1cd   :  { %v352_v0 = vpop.eup %351 }
 0x1ce   :  { %v232_v1 = vmul.f32 %v350_v58, %v231_v63  ;;  %v238_v2 = vmul.f32 %v352_v0, %v226_v59  ;;  %vm244_vm13 = vweird.f32 %v352_v0 }
 0x1cf   :  { %vm245_vm1 = vmor %vm243_vm15, %vm244_vm13 }
 0x1d0   :  { %v236_v4 = vsel %vm235_vm12, %v350_v58, %v232_v1  ;;  %v239_v5 = vmul.f32 %v352_v0, %v238_v2 }
 0x1d1   :  { %v247_v7 = vmul.f32 %v236_v4, %v213_v40 }
 0x1d2   :  { %v240_v8 = vmul.f32 0.5, %v239_v5 }
 0x1d3   :  { %v253_v9 = vmul.f32 %v340_v3, %v247_v7 }
 0x1d4   :  { %v241_v10 = vsub.f32 1.5, %v240_v8 }
 0x1d5   :  { %v259_v13 = vadd.f32 %v341_v6, %v253_v9 }
 0x1d6   :  { %v242_v14 = vmul.f32 %v352_v0, %v241_v10 }
 0x1d7   :  { %v261_v15 = vpack.c.bf16 %v259_v13, %v259_v13 }
 0x1d8   :  { %v246_v16 = vsel %vm245_vm1, %v352_v0, %v242_v14 }
 0x1d9   :  { %264 = vst.msk [vmem:[#allocation2] sm:$0xf] %vm263_vm14, %v261_v15  ;;  %v248_v18 = vmul.f32 %v246_v16, %v214_v44 }
 0x1db   :  { %v254_v19 = vmul.f32 %v340_v3, %v248_v18 }
 0x1dd   :  { %v260_v21 = vadd.f32 %v341_v6, %v254_v19 }
 0x1df   :  { %v262_v22 = vpack.c.bf16 %v260_v21, %v260_v21 }
 0x1e1   :  { %265 = vst.msk [vmem:[#allocation2 + $0x4] sm:$0xf] %vm263_vm14, %v262_v22 }
 0x1e8   :  { %v331_v12 = vld [vmem:[#allocation2] sm:$0xff] }
 0x1e9   :  { %330 = vmatmul.msk.bf16.vlgmr.msra.gmra.mxu1 %vm92_vm0, %v331_v12 }
 0x266   :  { %v296_v24 = vpop.f32.mrf.mxu1 }
 0x267   :  { %v297_v25 = vadd.f32 %v342_v23, %v296_v24 }
 0x269   :  { %301 = vst [vmem:[#allocation9] sm:$0xff] %v297_v25 }
 0x26e   :  { %v298_v26 = vpop.f32.mrf.mxu1 }
 0x26f   :  { %v299_v27 = vadd.f32 %v342_v23, %v298_v26 }
 0x271   :  { %302 = vst [vmem:[#allocation9 + $0x8] sm:$0xff] %v299_v27 }
 0x272   :  { %315 = dma.vmem_to_hbm [thread:$0]  %s308_s21, 256, %s310_s24, [#allocation5], %s456_s9, %s456_s9, %s457_s10  }
 0x273   :  { %453 = dma.done.wait [#allocation5], 256  }
 0x274   :  { %454 = vsyncadd [#allocation5], 4294967040 }
 0x275   :  { %320 = vsyncpa [#allocation4], 1 }
 0x276   :  { %321 = vsyncpa [#allocation7], 1 }
 0x277   :  { %322 = vsyncpa [#allocation5], 1 }

</bundles_post_ra>
